<compile_context>
chip_gen: v6e
topology: v6e:2x2x1
jax: 0.10.0
libtpu: 0.0.40
codegen_flags: <defaults>
</compile_context>

<pallas_src>
import jax
import jax.numpy as jnp
from jax.experimental import pallas as pl
from jax.experimental.pallas import tpu as pltpu

# ~4 MiB (f32) per stream per tile.
_TARGET_TILE_ELEMS = 1 << 20
_LANE_CANDIDATES = (2048, 1024, 512, 384, 256, 128)
_VMEM_LIMIT_BYTES = 48 * 1024 * 1024


def _sigmoid_mask_kernel(wb_ref, x_ref, m_ref, o_ref):
    # wb_ref: (2,) f32 in SMEM -> [weight, bias] of the 1x1 Conv2d(1, 1).
    w = wb_ref[0]
    b = wb_ref[1]
    y = x_ref[...] * w + b                      # 1x1 conv == per-pixel affine
    m = m_ref[...].astype(jnp.float32)          # mask may arrive bf16/int8: upcast on load
    o_ref[...] = (jax.nn.sigmoid(y) * m).astype(o_ref.dtype)


def _sigmoid_nomask_kernel(wb_ref, x_ref, o_ref):
    w = wb_ref[0]
    b = wb_ref[1]
    o_ref[...] = jax.nn.sigmoid(x_ref[...] * w + b).astype(o_ref.dtype)


def _pick_slab_shape(total, rows_natural, w_natural):
    """Zero-copy 2D view of the flattened tensor (no jnp.pad, ever)."""
    for lane in _LANE_CANDIDATES:
        if total % lane == 0:
            return total // lane, lane          # lane-dense: unmasked full-width vst
    # No multiple-of-128 lane divides `total`: use the natural (N*H, W) view.
    # Last block dim == full array dim -> (8,128) rule satisfied, still no pad.
    return rows_natural, w_natural


def _block_rows_for(rows, lane):
    # Multiple of 32 -> sublane-legal for f32 / bf16 / int8 tiles.
    target = max(32, (_TARGET_TILE_ELEMS // lane) // 32 * 32)
    if rows <= target:
        return rows                             # full extent: always layout-legal
    return target                               # ragged tail block masked by Pallas


def _row_axis_semantics():
    # v7x has 2 TensorCores/chip; CORE_PARALLEL shards the row axis across
    # both (plain "parallel" has near-zero effect). Gate per-generation so
    # single-TC chips (v5e/v6e) keep the plain semantics.
    try:
        kind = jax.devices()[0].device_kind.lower()
    except Exception:
        return pltpu.PARALLEL
    if "v7" in kind or "tpu7" in kind:
        return pltpu.CORE_PARALLEL
    return pltpu.PARALLEL


def sigmoid_forward(x, mask, w, b, use_mask=True, out_dtype=None):
    """Equivalent of sigmoid.forward(x, mask, use_mask).

    x:    (N, 1, H, W) float32   (NCHW, C == 1)
    mask: (N, H, W)    float32 / bfloat16 / int8 (0/1 values)
    w, b: scalars (conv weight (1,1,1,1) and bias (1,) collapsed to scalars)
    out_dtype: optional narrower output dtype (e.g. bf16) -- semantics change,
               defaults to x.dtype.
    returns (N, H, W) in out_dtype
    """
    N, C, H, W = x.shape
    assert C == 1
    total = N * H * W
    out_dtype = x.dtype if out_dtype is None else out_dtype

    rows, lane = _pick_slab_shape(total, N * H, W)
    block_rows = _block_rows_for(rows, lane)
    grid = (pl.cdiv(rows, block_rows),)         # ragged final block -> Pallas masks

    def to_slab(a):
        return a.reshape(rows, lane)            # free: contiguous, no pad emitted

    x2 = to_slab(x)
    wb = jnp.stack([jnp.asarray(w, jnp.float32).reshape(()),
                    jnp.asarray(b, jnp.float32).reshape(())])

    def tile_spec():
        return pl.BlockSpec((block_rows, lane), lambda i: (i, 0))

    smem_spec = pl.BlockSpec(memory_space=pltpu.SMEM)
    cparams = pltpu.CompilerParams(
        dimension_semantics=(_row_axis_semantics(),),
        vmem_limit_bytes=_VMEM_LIMIT_BYTES,
    )
    out_shape = jax.ShapeDtypeStruct((rows, lane), out_dtype)

    if use_mask:
        m2 = to_slab(mask)
        out2d = pl.pallas_call(
            _sigmoid_mask_kernel,
            out_shape=out_shape,
            grid=grid,
            in_specs=[smem_spec, tile_spec(), tile_spec()],
            out_specs=tile_spec(),
            compiler_params=cparams,
        )(wb, x2, m2)
    else:
        # No ones-mask materialization, one fewer HBM stream.
        out2d = pl.pallas_call(
            _sigmoid_nomask_kernel,
            out_shape=out_shape,
            grid=grid,
            in_specs=[smem_spec, tile_spec()],
            out_specs=tile_spec(),
            compiler_params=cparams,
        )(wb, x2)

    return out2d.reshape(N, H, W)               # free reshape: rows*lane == total


if __name__ == "__main__":
    key = jax.random.PRNGKey(0)
    kx, km, kw, kb = jax.random.split(key, 4)

    # Deterministic "parameters" of the 1x1 Conv2d(1, 1): weight, bias scalars.
    conv_w = jax.random.normal(kw, (), dtype=jnp.float32)
    conv_b = jax.random.normal(kb, (), dtype=jnp.float32)

    # --- Case 1: lane-dense path (total divisible by 128), bf16 mask stream ---
    N, C, H, W = 2, 1, 16, 16
    x = jax.random.normal(kx, (N, C, H, W), dtype=jnp.float32)
    mask = (jax.random.uniform(km, (N, H, W)) > 0.5).astype(jnp.bfloat16)  # 0/1, exact in bf16

    out = sigmoid_forward(x, mask, conv_w, conv_b, use_mask=True)
    jax.block_until_ready(out)
    ref = jax.nn.sigmoid(x[:, 0] * conv_w + conv_b) * mask.astype(jnp.float32)
    assert out.shape == (N, H, W)
    assert jnp.allclose(out, ref, atol=1e-6), "mismatch vs reference (mask path)"

    out2 = sigmoid_forward(x, mask, conv_w, conv_b, use_mask=False)
    jax.block_until_ready(out2)
    ref2 = jax.nn.sigmoid(x[:, 0] * conv_w + conv_b)
    assert jnp.allclose(out2, ref2, atol=1e-6), "mismatch vs reference (no mask)"

    # --- Case 2: non-divisible spatial size -> natural-view fallback, f32 mask ---
    N3, H3, W3 = 2, 15, 15
    kx3, km3 = jax.random.split(kx)
    x3 = jax.random.normal(kx3, (N3, 1, H3, W3), dtype=jnp.float32)
    mask3 = (jax.random.uniform(km3, (N3, H3, W3)) > 0.5).astype(jnp.float32)
    out3 = sigmoid_forward(x3, mask3, conv_w, conv_b, use_mask=True)
    jax.block_until_ready(out3)
    ref3 = jax.nn.sigmoid(x3[:, 0] * conv_w + conv_b) * mask3
    assert jnp.allclose(out3, ref3, atol=1e-6), "mismatch vs reference (fallback path)"

    print("KERNEL_OK")
</pallas_src>

<mosaic_0001>
module attributes {stable_mosaic.version = 11 : i64} {
  func.func @_sigmoid_mask_kernel(%arg0: i32, %arg1: memref<2xf32, #tpu.memory_space<smem>>, %arg2: memref<1x512xf32, #tpu.memory_space<vmem>>, %arg3: memref<1x512xbf16, #tpu.memory_space<vmem>>, %arg4: memref<1x512xf32, #tpu.memory_space<vmem>>) attributes {dimension_semantics = [#tpu.dimension_semantics<parallel>], iteration_bounds = array<i64: 1>, scalar_prefetch = 0 : i64, scratch_operands = 0 : i64, tpu.core_type = #tpu.core_type<tc>, window_params = [{transform_indices = @transform_0, window_bounds = array<i64: 2>}, {transform_indices = @transform_1, window_bounds = array<i64: 1, 512>}, {transform_indices = @transform_2, window_bounds = array<i64: 1, 512>}, {transform_indices = @transform_3, window_bounds = array<i64: 1, 512>}]} {
    %c0 = arith.constant 0 : index
    %0 = memref.load %arg1[%c0] : memref<2xf32, #tpu.memory_space<smem>>
    %c1 = arith.constant 1 : index
    %1 = memref.load %arg1[%c1] : memref<2xf32, #tpu.memory_space<smem>>
    %c0_0 = arith.constant 0 : index
    %c0_1 = arith.constant 0 : index
    %2 = vector.load %arg2[%c0_0, %c0_1] : memref<1x512xf32, #tpu.memory_space<vmem>>, vector<1x512xf32>
    %3 = vector.broadcast %0 : f32 to vector<1x512xf32>
    %4 = arith.mulf %2, %3 : vector<1x512xf32>
    %5 = vector.broadcast %1 : f32 to vector<1x512xf32>
    %6 = arith.addf %4, %5 : vector<1x512xf32>
    %c0_2 = arith.constant 0 : index
    %c0_3 = arith.constant 0 : index
    %7 = vector.load %arg3[%c0_2, %c0_3] : memref<1x512xbf16, #tpu.memory_space<vmem>>, vector<1x512xbf16>
    %8 = arith.extf %7 : vector<1x512xbf16> to vector<1x512xf32>
    %9 = arith.negf %6 : vector<1x512xf32>
    %10 = math.exp %9 : vector<1x512xf32>
    %cst = arith.constant 1.000000e+00 : f32
    %11 = vector.broadcast %cst : f32 to vector<1x512xf32>
    %12 = arith.addf %11, %10 : vector<1x512xf32>
    %13 = arith.divf %11, %12 : vector<1x512xf32>
    %14 = arith.mulf %13, %8 : vector<1x512xf32>
    %c0_4 = arith.constant 0 : index
    %c0_5 = arith.constant 0 : index
    %15 = vector.load %arg4[%c0_4, %c0_5] : memref<1x512xf32, #tpu.memory_space<vmem>>, vector<1x512xf32>
    tpu.vector_store %arg4[%c0_4, %c0_5], %14 {strides = array<i32>} : memref<1x512xf32, #tpu.memory_space<vmem>>, vector<1x512xf32>,
    return
  }
  func.func @transform_0(%arg0: i32) -> i32 {
    %c0_i32 = arith.constant 0 : i32
    %c0_i32_0 = arith.constant 0 : i32
    return %c0_i32 : i32
  }
  func.func @transform_1(%arg0: i32) -> (i32, i32) {
    %c0_i32 = arith.constant 0 : i32
    %c0_i32_0 = arith.constant 0 : i32
    return %arg0, %c0_i32 : i32, i32
  }
  func.func @transform_2(%arg0: i32) -> (i32, i32) {
    %c0_i32 = arith.constant 0 : i32
    %c0_i32_0 = arith.constant 0 : i32
    return %arg0, %c0_i32 : i32, i32
  }
  func.func @transform_3(%arg0: i32) -> (i32, i32) {
    %c0_i32 = arith.constant 0 : i32
    %c0_i32_0 = arith.constant 0 : i32
    return %arg0, %c0_i32 : i32, i32
  }
}

</mosaic_0001>

<bundles_post_ra>
// kernel: tpu_custom_call.1
= control target key start
LH: loop header
LB: loop body
LE: loop exit
PB: predicated region body
PF: predicated region fallthrough
CT: control target
= control target key end

     0   :  { %8 = vsyncpa [#allocation5], 0  ;;  %s221_s0 = inlined_call_operand.hbm [shape: f32[2], index: 0, kind: input, shape index: {}]   ;;  %s222_s1 = inlined_call_operand.hbm [shape: f32[1,512], index: 1, kind: input, shape index: {}]   ;;  %s223_s2 = inlined_call_operand.hbm [shape: bf16[1,512], index: 2, kind: input, shape index: {}]   ;;  %s224_s3 = inlined_call_operand.hbm [shape: f32[1,512], index: 3, kind: output, shape index: {}]  }
   0x1   :  { %9 = vsyncpa [#allocation3], 0 }
   0x2   :  { %10 = vsyncpa [#allocation8], 0 }
   0x3   :  { %11 = vsyncpa [#allocation4], 0  ;;  %s184_s12 = smov [#allocation2]   ;;  %s185_s15 = smov [#allocation6]  }
   0x4   :  { %19 = dma.hbm_to_smem %s221_s0, 16, %s184_s12, [#allocation5]  }
   0x5   :  { %s26_s16 = sshll.u32 %s185_s15, 4  ;;  %s186_s17 = smov [#allocation7]   ;;  %s27_s16 = int_to_ptr.vmem [resolvable:$true] %s26_s16 }
   0x6   :  { %s36_s18 = sshll.u32 %s186_s17, 4  ;;  %s124_s19 = scalar_lea.vmem %s27_s16, 64  ;;  %s37_s18 = int_to_ptr.vmem [resolvable:$true] %s36_s18 }
   0x7   :  { %p125_p0 = scmp.ne.s32.totalorder %s27_s16, %s124_s19  ;;  %p129_p1 = scmp.lt.s32.totalorder %s27_s16, %s27_s16 }
   0x8   :  { %p130_p2 = scmp.lt.s32.totalorder %s124_s19, %s124_s19 }
   0xa   :  { %p131_p3 = por %p130_p2, %p129_p1 }
   0xc   :  { %p132_p4 = pnand %p131_p3, %p125_p0 }
   0xe   :  { %135 = shalt.err (!%p132_p4)
}
   0xf   :  { %29 = dma.hbm_to_vmem [thread:$0]  %s222_s1, 64, %s27_s16, [#allocation3]  }
  0x10   :  { %s144_s22 = scalar_lea.vmem %s37_s18, 64  ;;  %p149_p6 = scmp.lt.s32.totalorder %s37_s18, %s37_s18 }
  0x11   :  { %p145_p5 = scmp.ne.s32.totalorder %s37_s18, %s144_s22  ;;  %p150_p7 = scmp.lt.s32.totalorder %s144_s22, %s144_s22 }
  0x13   :  { %p151_p8 = por %p150_p7, %p149_p6 }
  0x15   :  { %p152_p9 = pnand %p151_p8, %p145_p5 }
  0x17   :  { %155 = shalt.err (!%p152_p9)
}
  0x18   :  { %39 = dma.hbm_to_vmem [thread:$0]  %s223_s2, 64, %s37_s18, [#allocation8]  }
  0x19   :  { %176 = dma.done.wait [#allocation5], 16  }
  0x1a   :  { %177 = vsyncadd [#allocation5], 4294967280 }
  0x1b   :  { %178 = dma.done.wait [#allocation3], 64  }
  0x1c   :  { %179 = vsyncadd [#allocation3], 4294967232 }
  0x1d   :  { %180 = dma.done.wait [#allocation8], 64  }
  0x1e   :  { %181 = vsyncadd [#allocation8], 4294967232 }
  0x1f   :  { %49 = sfence }
  0x20   :  { %s50_s1 = sld [smem:[#allocation2]]  ;;  %v52_v0 = vld [vmem:[#allocation6] sm:$0xf]  ;;  %v187_v8 = vmov 1966171168   ;;  %v69_v10 = vlaneseq  ;;  %s188_s2 = smov [#allocation9]  }
  0x21   :  { %s97_s24 = sld [smem:[#allocation2 + $0x1]]  ;;  %v67_v9 = vunpack.c.l.s4 %v187_v8  ;;  %v57_v13 = vld [vmem:[#allocation7] sm:$0xf]  ;;  %s86_s25 = sshll.u32 %s188_s2, 4  ;;  %s87_s25 = int_to_ptr.vmem [resolvable:$true] %s86_s25 }
  0x22   :  { %v70_v12 = vshrl.u32 %v69_v10, 7  ;;  %v58_v14 = vunpack.c.l.bf16 %v57_v13  ;;  %vm77_vm0 = vcmp.lt.s32.totalorder %v69_v10, 512  ;;  %s156_s26 = scalar_lea.vmem %s87_s25, 64  ;;  %p161_p11 = scmp.lt.s32.totalorder %s87_s25, %s87_s25 }
  0x23   :  { %v68_v11 = vunpack.c.0.s8 %v67_v9  ;;  %p157_p10 = scmp.ne.s32.totalorder %s87_s25, %s156_s26  ;;  %p162_p12 = scmp.lt.s32.totalorder %s156_s26, %s156_s26 }
  0x25   :  { %v71_v15 = vsub.s32 %v68_v11, %v70_v12  ;;  %p163_p13 = por %p162_p12, %p161_p11 }
  0x26   :  { %v53_v1 = vstv %s50_s1 }
  0x27   :  { %v54_v2 = vmul.f32 %v53_v1, %v52_v0  ;;  %v55_v3 = vstv %s97_s24  ;;  %v72_v16 = vrot.slane %v58_v14, %v71_v15  ;;  %p164_p0 = pnand %p163_p13, %p157_p10 }
  0x29   :  { %v56_v4 = vadd.f32 %v55_v3, %v54_v2 }
  0x2b   :  { %v98_v5 = vmul.f32 -1.442695, %v56_v4 }
  0x2d   :  { %104 = vpow2.f32 %v98_v5 }
  0x3a   :  { %v105_v6 = vpop.eup %104 }
  0x3b   :  { %v62_v7 = vadd.f32 1.0, %v105_v6 }
  0x3d   :  { %106 = vrcp.f32 %v62_v7 }
  0x4a   :  { %v107_v17 = vpop.eup %106 }
  0x4b   :  { %v74_v18 = vmul.f32 %v107_v17, %v72_v16 }
  0x4d   :  { %79 = vst.msk [vmem:[#allocation9] sm:$0xf] %vm77_vm0, %v74_v18 }
  0x4e   :  { %167 = shalt.err (!%p164_p0)
}
  0x4f   :  { %89 = dma.vmem_to_hbm [thread:$0]  %s87_s25, 64, %s224_s3, [#allocation4]  }
  0x50   :  { %182 = dma.done.wait [#allocation4], 64  }
  0x51   :  { %183 = vsyncadd [#allocation4], 4294967232 }
  0x52   :  { %93 = vsyncpa [#allocation3], 1 }
  0x53   :  { %94 = vsyncpa [#allocation8], 1 }
  0x54   :  { %95 = vsyncpa [#allocation4], 1 }
  0x55   :  { %96 = vsyncpa [#allocation5], 1 }

</bundles_post_ra>
